<compile_context>
chip_gen: v6e
topology: v6e:2x2x1
jax: 0.10.0
libtpu: 0.0.40
codegen_flags: <defaults>
</compile_context>

<pallas_src>
import functools

import numpy as np
import jax
import jax.numpy as jnp
from jax import lax
from jax.experimental import pallas as pl
from jax.experimental.pallas import tpu as pltpu


def _round_up(a, b):
    return (a + b - 1) // b * b


# ---------------------------------------------------------------------------
# Generation-aware VMEM budgeting (same number feeds tile choice AND
# vmem_limit_bytes).
# ---------------------------------------------------------------------------
_SLACK = 4 << 20  # headroom for compiler-internal scratch


def _vmem_budget_bytes():
    phys = 64 << 20                      # conservative fallback = v7x physical
    try:
        phys = int(pltpu.get_tpu_info().vmem_capacity_bytes)
    except Exception:
        pass
    return int(phys) * 7 // 10           # ~45 MiB on v7x, ~90 MiB on v5e/v6e


def _vmem_row_bytes(f):
    # One f32 row in VMEM ((8,128) tiling pads the lane dim to 128), counting
    # x / out double buffers + sc/sh matmul temporaries (~6 row buffers, the
    # apply-pass worst case) plus one-hot / label rows.
    f_lanes = _round_up(max(f, 1), 128)
    return 6 * 4 * f_lanes + 2 * (512 + 32)


def _table_bytes(d_pad, f):
    f_lanes = _round_up(max(f, 1), 128)
    return 8 * 4 * d_pad * f_lanes


def _fits_fused(n, f, d_pad, budget):
    n_sub = _round_up(max(n, 8), 8)
    return n_sub * _vmem_row_bytes(f) + _table_bytes(d_pad, f) + _SLACK <= budget


def _choose_tile_n(f, d_pad, budget):
    avail = budget - _table_bytes(d_pad, f) - _SLACK
    rows = max(avail // _vmem_row_bytes(f), 128)
    tile = int(min(rows, 2048))
    return max((tile // 128) * 128, 128)  # multiple of 128 (lane-dense y_row blocks)


# ---------------------------------------------------------------------------
# Shared finalize math: per-domain stats -> fused per-domain affine tables.
#   count > 1 : batch stats (training-mode BN, biased variance)
#   count ==1 : running stats (eval-mode BN)
#   count ==0 : scale = shift = 0 (no row selects it)
# ---------------------------------------------------------------------------
def _finalize_tables(sums, sqs, cnt, w, b, rm, rv, eps):
    safe = jnp.maximum(cnt, 1.0)
    mean = sums / safe
    var = jnp.maximum(sqs / safe - mean * mean, 0.0)
    use_batch = cnt > 1.0
    mu = jnp.where(use_batch, mean, rm)
    sigma2 = jnp.where(use_batch, var, rv)
    present = cnt > 0.0
    inv = lax.rsqrt(sigma2 + eps)
    scale = jnp.where(present, w * inv, 0.0)
    shift = jnp.where(present, b - mu * scale, 0.0)
    return scale, shift


# ---------------------------------------------------------------------------
# Fused single-invocation kernel (small N): stats + finalize + apply.
# ---------------------------------------------------------------------------
def _fused_kernel(x_ref, yrow_ref, ycol_ref, w_ref, b_ref, rm_ref, rv_ref,
                  out_ref, *, eps):
    x = x_ref[...].astype(jnp.float32)                    # (N, F)
    yr = yrow_ref[...]                                    # (1, N)
    yc = ycol_ref[...]                                    # (N, 1)
    n = x.shape[0]
    d = w_ref.shape[0]

    dom_dn = lax.broadcasted_iota(jnp.int32, (d, n), 0)
    onehot_t = (yr == dom_dn).astype(jnp.float32)         # (D, N)
    dom_nd = lax.broadcasted_iota(jnp.int32, (n, d), 1)
    onehot = (yc == dom_nd).astype(jnp.float32)           # (N, D)

    sums = jnp.dot(onehot_t, x, preferred_element_type=jnp.float32)      # (D, F)
    sqs = jnp.dot(onehot_t, x * x, preferred_element_type=jnp.float32)   # (D, F)
    cnt = jnp.sum(onehot_t, axis=1, keepdims=True)                        # (D, 1)

    scale, shift = _finalize_tables(sums, sqs, cnt, w_ref[...], b_ref[...],
                                    rm_ref[...], rv_ref[...], eps)

    sc = jnp.dot(onehot, scale, preferred_element_type=jnp.float32)       # (N, F)
    sh = jnp.dot(onehot, shift, preferred_element_type=jnp.float32)
    out_ref[...] = (x * sc + sh).astype(out_ref.dtype)


# ---------------------------------------------------------------------------
# Tiled pass 1: per-domain raw sum / sum-of-squares / count, accumulated
# directly into resident per-core output slices (no scratch, no param tables).
# Grid = (core_split=2 "parallel", row tiles "arbitrary").
# ---------------------------------------------------------------------------
def _stats_kernel(x_ref, y_ref, sum_ref, sq_ref, cnt_ref, *,
                  n_rows, tiles_per_core):
    c = pl.program_id(0)
    t = pl.program_id(1)

    @pl.when(t == 0)
    def _():
        sum_ref[...] = jnp.zeros_like(sum_ref)
        sq_ref[...] = jnp.zeros_like(sq_ref)
        cnt_ref[...] = jnp.zeros_like(cnt_ref)

    x = x_ref[...].astype(jnp.float32)                    # (TILE_N, F)
    y = y_ref[...]                                        # (1, TILE_N) int32
    tile_n = x.shape[0]
    d = sum_ref.shape[0]
    start = (c * tiles_per_core + t) * tile_n             # logical row offset

    # Tail masking: partial blocks contain garbage, and 0 * NaN = NaN in the
    # matmul accumulation, so mask x itself AND the one-hot.
    row_ids = start + lax.broadcasted_iota(jnp.int32, (tile_n, 1), 0)
    xm = jnp.where(row_ids < n_rows, x, 0.0)

    col_ids = start + lax.broadcasted_iota(jnp.int32, (1, tile_n), 1)
    col_valid = col_ids < n_rows
    dom = lax.broadcasted_iota(jnp.int32, (d, tile_n), 0)
    onehot_t = jnp.logical_and(y == dom, col_valid).astype(jnp.float32)   # (D, TILE_N)

    sum_ref[...] += jnp.dot(onehot_t, xm, preferred_element_type=jnp.float32)
    sq_ref[...] += jnp.dot(onehot_t, xm * xm, preferred_element_type=jnp.float32)
    cnt_ref[...] += jnp.sum(onehot_t, axis=1, keepdims=True)              # (D, 1)


# ---------------------------------------------------------------------------
# Tiled pass 2: gather per-row scale/shift via one-hot matmul; every output
# element written exactly once.
# ---------------------------------------------------------------------------
def _apply_kernel(x_ref, y_ref, scale_ref, shift_ref, out_ref):
    x = x_ref[...].astype(jnp.float32)                    # (TILE_N, F)
    y = y_ref[...]                                        # (TILE_N, 1) int32
    tile_n = x.shape[0]
    d = scale_ref.shape[0]

    dom = lax.broadcasted_iota(jnp.int32, (tile_n, d), 1)
    onehot = (y == dom).astype(jnp.float32)               # (TILE_N, D)

    sc = jnp.dot(onehot, scale_ref[...], preferred_element_type=jnp.float32)
    sh = jnp.dot(onehot, shift_ref[...], preferred_element_type=jnp.float32)
    out_ref[...] = (x * sc + sh).astype(out_ref.dtype)


# ---------------------------------------------------------------------------
# Wrapper.
# ---------------------------------------------------------------------------
@functools.partial(jax.jit,
                   static_argnames=("n_domain", "eps", "force_two_pass", "tile_n"))
def ds_batch_norm(x, y, weight, bias, running_mean, running_var, *, n_domain,
                  eps=1e-5, force_two_pass=False, tile_n=None):
    """x: (N, F) float, y: (N,) int in [0, n_domain). Returns (N, F) float32."""
    N, F = x.shape
    D = n_domain
    f32 = jnp.float32
    D_pad = _round_up(max(D, 8), 8)

    budget = _vmem_budget_bytes()

    y32 = y.reshape(-1).astype(jnp.int32)
    y_row = y32.reshape(1, N)
    y_col = y32.reshape(N, 1)

    def pad_tab(a, fill):
        a = a.astype(f32).reshape(D, F)
        return jnp.pad(a, ((0, D_pad - D), (0, 0)), constant_values=fill)

    w_p = pad_tab(weight, 1.0)
    b_p = pad_tab(bias, 0.0)
    rm_p = pad_tab(running_mean, 0.0)
    rv_p = pad_tab(running_var, 1.0)

    # ---------------- Fused single-call fast path ----------------
    if (not force_two_pass) and _fits_fused(N, F, D_pad, budget):
        return pl.pallas_call(
            functools.partial(_fused_kernel, eps=eps),
            out_shape=jax.ShapeDtypeStruct((N, F), f32),
            compiler_params=pltpu.CompilerParams(vmem_limit_bytes=budget),
        )(x, y_row, y_col, w_p, b_p, rm_p, rv_p)

    # ---------------- Tiled two-pass path ----------------
    TILE_N = tile_n if tile_n is not None else _choose_tile_n(F, D_pad, budget)
    num_tiles = pl.cdiv(N, TILE_N)
    tiles_per_core = pl.cdiv(num_tiles, 2)
    nmax = num_tiles - 1

    def tile_idx(c, t):
        # Clamp so the (possibly) over-provisioned core-1 tail never maps a
        # block outside the array; its contribution is killed by row masking.
        return jnp.minimum(c * tiles_per_core + t, nmax)

    # Pass 1: per-core partial sums (leading axis "parallel" -> both v7x TCs).
    sums2, sqs2, cnt2 = pl.pallas_call(
        functools.partial(_stats_kernel, n_rows=N, tiles_per_core=tiles_per_core),
        out_shape=(jax.ShapeDtypeStruct((2, D_pad, F), f32),
                   jax.ShapeDtypeStruct((2, D_pad, F), f32),
                   jax.ShapeDtypeStruct((2, D_pad, 1), f32)),
        grid_spec=pltpu.PrefetchScalarGridSpec(
            num_scalar_prefetch=0,
            grid=(2, tiles_per_core),
            in_specs=[pl.BlockSpec((TILE_N, F), lambda c, t: (tile_idx(c, t), 0)),
                      pl.BlockSpec((1, TILE_N), lambda c, t: (0, tile_idx(c, t)))],
            out_specs=(pl.BlockSpec((None, D_pad, F), lambda c, t: (c, 0, 0)),
                       pl.BlockSpec((None, D_pad, F), lambda c, t: (c, 0, 0)),
                       pl.BlockSpec((None, D_pad, 1), lambda c, t: (c, 0, 0)))),
        compiler_params=pltpu.CompilerParams(
            dimension_semantics=("parallel", "arbitrary"),
            vmem_limit_bytes=budget),
    )(x, y_row)

    # Tiny (D, F) cross-core reduce + finalize in plain JAX.
    scale, shift = _finalize_tables(sums2.sum(axis=0), sqs2.sum(axis=0),
                                    cnt2.sum(axis=0), w_p, b_p, rm_p, rv_p, eps)

    # Pass 2: independent row tiles -> parallel (megacore sharding).
    out = pl.pallas_call(
        _apply_kernel,
        out_shape=jax.ShapeDtypeStruct((N, F), f32),
        grid_spec=pltpu.PrefetchScalarGridSpec(
            num_scalar_prefetch=0,
            grid=(num_tiles,),
            in_specs=[pl.BlockSpec((TILE_N, F), lambda t: (t, 0)),
                      pl.BlockSpec((TILE_N, 1), lambda t: (t, 0)),
                      pl.BlockSpec((D_pad, F), lambda t: (0, 0)),
                      pl.BlockSpec((D_pad, F), lambda t: (0, 0))],
            out_specs=pl.BlockSpec((TILE_N, F), lambda t: (t, 0))),
        compiler_params=pltpu.CompilerParams(
            dimension_semantics=("parallel",),
            vmem_limit_bytes=budget),
    )(x, y_col, scale, shift)
    return out


# ---------------------------------------------------------------------------
# NumPy reference (mirrors the PyTorch module's forward).
# ---------------------------------------------------------------------------
def _reference(x, y, weight, bias, running_mean, running_var, n_domain, eps):
    x = np.asarray(x, dtype=np.float32)
    y = np.asarray(y)
    w = np.asarray(weight); b = np.asarray(bias)
    rm = np.asarray(running_mean); rv = np.asarray(running_var)
    out = np.zeros_like(x)
    for i in range(n_domain):
        idx = np.where(y == i)[0]
        if len(idx) > 1:
            xs = x[idx]
            m = xs.mean(axis=0)
            v = xs.var(axis=0)  # biased variance (BN training mode)
            out[idx] = (xs - m) / np.sqrt(v + eps) * w[i] + b[i]
        elif len(idx) == 1:
            xs = x[idx]
            out[idx] = (xs - rm[i]) / np.sqrt(rv[i] + eps) * w[i] + b[i]
    return out


if __name__ == "__main__":
    num_features = 32
    eps = 1e-5

    # ---- Test 1: small batch -> fused single-call path ----
    n_domain = 3
    N = 8
    k = jax.random.split(jax.random.PRNGKey(0), 5)
    x = jax.random.normal(k[0], (N, num_features), dtype=jnp.float32)
    # Domain 0 -> 4 rows (train), domain 1 -> 3 rows (train), domain 2 -> 1 row (eval).
    y = jnp.array([0, 0, 0, 1, 1, 1, 2, 0], dtype=jnp.int32)
    weight = jax.random.uniform(k[1], (n_domain, num_features),
                                minval=0.5, maxval=1.5, dtype=jnp.float32)
    bias = 0.1 * jax.random.normal(k[2], (n_domain, num_features), dtype=jnp.float32)
    running_mean = 0.1 * jax.random.normal(k[3], (n_domain, num_features),
                                           dtype=jnp.float32)
    running_var = jax.random.uniform(k[4], (n_domain, num_features),
                                     minval=0.5, maxval=1.5, dtype=jnp.float32)

    out = ds_batch_norm(x, y, weight, bias, running_mean, running_var,
                        n_domain=n_domain, eps=eps)
    out = jax.block_until_ready(out)
    ref = _reference(x, y, weight, bias, running_mean, running_var, n_domain, eps)
    np.testing.assert_allclose(np.asarray(out), ref, rtol=1e-4, atol=1e-4)

    # ---- Test 2: larger batch, forced two-pass tiled path (partial tiles,
    # empty domain, singleton domain, per-core split + tail masking) ----
    n_domain2 = 4
    N2 = 300
    k2 = jax.random.split(jax.random.PRNGKey(1), 6)
    x2 = jax.random.normal(k2[0], (N2, num_features), dtype=jnp.float32)
    labels = jnp.concatenate([jnp.zeros(150, jnp.int32),
                              jnp.ones(149, jnp.int32),
                              jnp.full((1,), 2, jnp.int32)])   # domain 3 is empty
    y2 = jax.random.permutation(k2[1], labels)
    w2 = jax.random.uniform(k2[2], (n_domain2, num_features),
                            minval=0.5, maxval=1.5, dtype=jnp.float32)
    b2 = 0.1 * jax.random.normal(k2[3], (n_domain2, num_features), dtype=jnp.float32)
    rm2 = 0.1 * jax.random.normal(k2[4], (n_domain2, num_features), dtype=jnp.float32)
    rv2 = jax.random.uniform(k2[5], (n_domain2, num_features),
                             minval=0.5, maxval=1.5, dtype=jnp.float32)

    out2 = ds_batch_norm(x2, y2, w2, b2, rm2, rv2, n_domain=n_domain2, eps=eps,
                         force_two_pass=True, tile_n=128)
    out2 = jax.block_until_ready(out2)
    ref2 = _reference(x2, y2, w2, b2, rm2, rv2, n_domain2, eps)
    np.testing.assert_allclose(np.asarray(out2), ref2, rtol=1e-4, atol=1e-4)

    print("KERNEL_OK")
</pallas_src>

<mosaic_0001>
module attributes {stable_mosaic.version = 11 : i64} {
  func.func @_fused_kernel(%arg0: memref<8x32xf32, #tpu.memory_space<vmem>>, %arg1: memref<1x8xi32, #tpu.memory_space<vmem>>, %arg2: memref<8x1xi32, #tpu.memory_space<vmem>>, %arg3: memref<8x32xf32, #tpu.memory_space<vmem>>, %arg4: memref<8x32xf32, #tpu.memory_space<vmem>>, %arg5: memref<8x32xf32, #tpu.memory_space<vmem>>, %arg6: memref<8x32xf32, #tpu.memory_space<vmem>>, %arg7: memref<8x32xf32, #tpu.memory_space<vmem>>) attributes {dimension_semantics = [], scalar_prefetch = 0 : i64, scratch_operands = 0 : i64, tpu.core_type = #tpu.core_type<tc>} {
    %c0 = arith.constant 0 : index
    %c0_0 = arith.constant 0 : index
    %0 = vector.load %arg0[%c0, %c0_0] : memref<8x32xf32, #tpu.memory_space<vmem>>, vector<8x32xf32>
    %c0_1 = arith.constant 0 : index
    %c0_2 = arith.constant 0 : index
    %1 = vector.load %arg1[%c0_1, %c0_2] : memref<1x8xi32, #tpu.memory_space<vmem>>, vector<1x8xi32>
    %c0_3 = arith.constant 0 : index
    %c0_4 = arith.constant 0 : index
    %2 = vector.load %arg2[%c0_3, %c0_4] : memref<8x1xi32, #tpu.memory_space<vmem>>, vector<8x1xi32>
    %3 = tpu.iota {dimensions = array<i32: 0>} : vector<8x8xi32>
    %4 = vector.broadcast %1 : vector<1x8xi32> to vector<8x8xi32>
    %5 = arith.cmpi eq, %4, %3 : vector<8x8xi32>
    %6 = arith.extui %5 : vector<8x8xi1> to vector<8x8xi32>
    %7 = arith.sitofp %6 : vector<8x8xi32> to vector<8x8xf32>
    %8 = tpu.iota {dimensions = array<i32: 1>} : vector<8x8xi32>
    %9 = vector.broadcast %2 : vector<8x1xi32> to vector<8x8xi32>
    %10 = arith.cmpi eq, %9, %8 : vector<8x8xi32>
    %11 = arith.extui %10 : vector<8x8xi1> to vector<8x8xi32>
    %12 = arith.sitofp %11 : vector<8x8xi32> to vector<8x8xf32>
    %cst = arith.constant dense<0.000000e+00> : vector<8x32xf32>
    %13 = tpu.matmul %7, %0, %cst {dimension_numbers = #tpu.dot_dimension_numbers<[1], [0], [0], [1], [0, 0, 1, 1], [], []>} : vector<8x8xf32>, vector<8x32xf32>, vector<8x32xf32> -> vector<8x32xf32>
    %14 = arith.mulf %0, %0 : vector<8x32xf32>
    %cst_5 = arith.constant dense<0.000000e+00> : vector<8x32xf32>
    %15 = tpu.matmul %7, %14, %cst_5 {dimension_numbers = #tpu.dot_dimension_numbers<[1], [0], [0], [1], [0, 0, 1, 1], [], []>} : vector<8x8xf32>, vector<8x32xf32>, vector<8x32xf32> -> vector<8x32xf32>
    %cst_6 = arith.constant dense<0.000000e+00> : vector<8xf32>
    %16 = vector.multi_reduction <add>, %7, %cst_6 [1] : vector<8x8xf32> to vector<8xf32>
    %17 = vector.shape_cast %16 : vector<8xf32> to vector<8x1xf32>
    %c0_7 = arith.constant 0 : index
    %c0_8 = arith.constant 0 : index
    %18 = vector.load %arg3[%c0_7, %c0_8] : memref<8x32xf32, #tpu.memory_space<vmem>>, vector<8x32xf32>
    %c0_9 = arith.constant 0 : index
    %c0_10 = arith.constant 0 : index
    %19 = vector.load %arg4[%c0_9, %c0_10] : memref<8x32xf32, #tpu.memory_space<vmem>>, vector<8x32xf32>
    %c0_11 = arith.constant 0 : index
    %c0_12 = arith.constant 0 : index
    %20 = vector.load %arg5[%c0_11, %c0_12] : memref<8x32xf32, #tpu.memory_space<vmem>>, vector<8x32xf32>
    %c0_13 = arith.constant 0 : index
    %c0_14 = arith.constant 0 : index
    %21 = vector.load %arg6[%c0_13, %c0_14] : memref<8x32xf32, #tpu.memory_space<vmem>>, vector<8x32xf32>
    %cst_15 = arith.constant 1.000000e+00 : f32
    %22 = vector.broadcast %cst_15 : f32 to vector<8x1xf32>
    %23 = arith.maximumf %17, %22 : vector<8x1xf32>
    %24 = vector.broadcast %23 : vector<8x1xf32> to vector<8x32xf32>
    %25 = arith.divf %13, %24 : vector<8x32xf32>
    %26 = vector.broadcast %23 : vector<8x1xf32> to vector<8x32xf32>
    %27 = arith.divf %15, %26 : vector<8x32xf32>
    %28 = arith.mulf %25, %25 : vector<8x32xf32>
    %29 = arith.subf %27, %28 : vector<8x32xf32>
    %cst_16 = arith.constant 0.000000e+00 : f32
    %30 = vector.broadcast %cst_16 : f32 to vector<8x32xf32>
    %31 = arith.maximumf %29, %30 : vector<8x32xf32>
    %cst_17 = arith.constant 1.000000e+00 : f32
    %32 = vector.broadcast %cst_17 : f32 to vector<8x1xf32>
    %33 = arith.cmpf ogt, %17, %32 : vector<8x1xf32>
    %34 = vector.shape_cast %33 : vector<8x1xi1> to vector<8x1xi1>
    %35 = vector.broadcast %34 : vector<8x1xi1> to vector<8x32xi1>
    %36 = arith.select %35, %25, %20 : vector<8x32xi1>, vector<8x32xf32>
    %37 = vector.shape_cast %33 : vector<8x1xi1> to vector<8x1xi1>
    %38 = vector.broadcast %37 : vector<8x1xi1> to vector<8x32xi1>
    %39 = arith.select %38, %31, %21 : vector<8x32xi1>, vector<8x32xf32>
    %cst_18 = arith.constant 0.000000e+00 : f32
    %40 = vector.broadcast %cst_18 : f32 to vector<8x1xf32>
    %41 = arith.cmpf ogt, %17, %40 : vector<8x1xf32>
    %cst_19 = arith.constant 9.99999974E-6 : f32
    %42 = vector.broadcast %cst_19 : f32 to vector<8x32xf32>
    %43 = arith.addf %39, %42 : vector<8x32xf32>
    %44 = math.rsqrt %43 : vector<8x32xf32>
    %45 = arith.mulf %18, %44 : vector<8x32xf32>
    %cst_20 = arith.constant 0.000000e+00 : f32
    %46 = vector.shape_cast %41 : vector<8x1xi1> to vector<8x1xi1>
    %47 = vector.broadcast %46 : vector<8x1xi1> to vector<8x32xi1>
    %48 = vector.broadcast %cst_20 : f32 to vector<8x32xf32>
    %49 = arith.select %47, %45, %48 : vector<8x32xi1>, vector<8x32xf32>
    %50 = arith.mulf %36, %49 : vector<8x32xf32>
    %51 = arith.subf %19, %50 : vector<8x32xf32>
    %cst_21 = arith.constant 0.000000e+00 : f32
    %52 = vector.shape_cast %41 : vector<8x1xi1> to vector<8x1xi1>
    %53 = vector.broadcast %52 : vector<8x1xi1> to vector<8x32xi1>
    %54 = vector.broadcast %cst_21 : f32 to vector<8x32xf32>
    %55 = arith.select %53, %51, %54 : vector<8x32xi1>, vector<8x32xf32>
    %cst_22 = arith.constant dense<0.000000e+00> : vector<8x32xf32>
    %56 = tpu.matmul %12, %49, %cst_22 {dimension_numbers = #tpu.dot_dimension_numbers<[1], [0], [0], [1], [0, 0, 1, 1], [], []>} : vector<8x8xf32>, vector<8x32xf32>, vector<8x32xf32> -> vector<8x32xf32>
    %cst_23 = arith.constant dense<0.000000e+00> : vector<8x32xf32>
    %57 = tpu.matmul %12, %55, %cst_23 {dimension_numbers = #tpu.dot_dimension_numbers<[1], [0], [0], [1], [0, 0, 1, 1], [], []>} : vector<8x8xf32>, vector<8x32xf32>, vector<8x32xf32> -> vector<8x32xf32>
    %58 = arith.mulf %0, %56 : vector<8x32xf32>
    %59 = arith.addf %58, %57 : vector<8x32xf32>
    %c0_24 = arith.constant 0 : index
    %c0_25 = arith.constant 0 : index
    %60 = vector.load %arg7[%c0_24, %c0_25] : memref<8x32xf32, #tpu.memory_space<vmem>>, vector<8x32xf32>
    tpu.vector_store %arg7[%c0_24, %c0_25], %59 {strides = array<i32>} : memref<8x32xf32, #tpu.memory_space<vmem>>, vector<8x32xf32>,
    return
  }
}

</mosaic_0001>

<bundles_post_ra>
// kernel: ds_batch_norm.1
= control target key start
LH: loop header
LB: loop body
LE: loop exit
PB: predicated region body
PF: predicated region fallthrough
CT: control target
= control target key end

     0   :  { %v30_v1 = vlaneseq  ;;  %v450_v2 = vmov 0.0   ;;  %s533_s0 = inlined_call_operand.vmem [shape: f32[8,32], index: 0, kind: input, shape index: {}]   ;;  %s534_s1 = inlined_call_operand.vmem [shape: s32[1,8], index: 1, kind: input, shape index: {}]   ;;  %s535_s2 = inlined_call_operand.vmem [shape: s32[8,1], index: 2, kind: input, shape index: {}]   ;;  %s536_s3 = inlined_call_operand.vmem [shape: f32[8,32], index: 3, kind: input, shape index: {}]   ;;  %s537_s4 = inlined_call_operand.vmem [shape: f32[8,32], index: 4, kind: input, shape index: {}]   ;;  %s538_s5 = inlined_call_operand.vmem [shape: f32[8,32], index: 5, kind: input, shape index: {}]   ;;  %s539_s6 = inlined_call_operand.vmem [shape: f32[8,32], index: 6, kind: input, shape index: {}]   ;;  %s540_s7 = inlined_call_operand.hbm [shape: f32[8,32], index: 7, kind: output, shape index: {}]  }
   0x1   :  { %v497_v0 = vld [vmem:[%s533_s0] sm:$0xff]  ;;  %399 = vmatprep.subr.mxu0 %v450_v2  ;;  %404 = vmatprep.subr.mxu1 %v450_v2 }
   0x2   :  { %v121_v3 = vmul.f32 %v497_v0, %v497_v0  ;;  %v382_v4 = vld [vmem:[%s534_s1] ss:$0 sm:$0xff] }
   0x3   :  { %12 = vsyncpa [#allocation3], 0  ;;  %400 = vmatpush3.msra.mxu0 %v497_v0  ;;  %vm451_vm0 = vmmov 0   ;;  %v31_v5 = vshrl.u32 %v30_v1, 7  ;;  %vm47_vm1 = vcmask 64512   ;;  %v452_v6 = vmov 0  }
   0x4   :  { %401 = vmatprep.mubr.msk.f32.mxu0 %vm451_vm0, %v450_v2  ;;  %405 = vmatpush3.msra.mxu1 %v121_v3  ;;  %v29_v9 = vld [vmem:[%s535_s2] sm:$0xff]  ;;  %v40_v25 = vand.u32 127, %v30_v1  ;;  %vm366_vm6 = vcmask 261120  }
   0x5   :  { %406 = vmatprep.mubr.msk.f32.mxu1 %vm451_vm0, %v450_v2  ;;  %vm36_vm2 = vcmp.eq.s32.totalorder %v382_v4, %v31_v5  ;;  %423 = vset.pattern.permute.xlu0 %v452_v6  ;;  %v198_v21 = vld [vmem:[%s539_s6] sm:$0xff] }
   0x6   :  { %409 = vmatprep.subr.mxu0 %v450_v2  ;;  %v383_v7 = vsel %vm36_vm2, 1.0, %v450_v2  ;;  %414 = vmatprep.subr.mxu1 %v450_v2  ;;  %v195_v27 = vld [vmem:[%s536_s3] sm:$0xff]  ;;  %s453_s3 = smov [#allocation2]  }
   0x7   :  { %402 = vmatmul.mubr.msk.f32.vlgmr.msra.gmra.mxu0 %vm47_vm1, %v383_v7  ;;  %407 = vmatmul.mubr.msk.f32.vlgmr.msra.gmra.mxu1 %vm47_vm1, %v383_v7  ;;  %v192_v8 = vsel %vm47_vm1, %v383_v7, 0.0  ;;  %v197_v29 = vld [vmem:[%s538_s5] sm:$0xff]  ;;  %s374_s5 = sshll.u32 %s453_s3, 4  ;;  %s375_s5 = int_to_ptr.vmem [resolvable:$true] %s374_s5 }
   0x8   :  { %193 = vadd.xlane.f32.xlu0 %v192_v8  ;;  %411 = vmatprep.mubr.msk.f32.mxu0 %vm451_vm0, %v450_v2  ;;  %v196_v34 = vld [vmem:[%s537_s4] sm:$0xff]  ;;  %s428_s4 = scalar_lea.vmem %s375_s5, 128  ;;  %p433_p1 = scmp.lt.s32.totalorder %s375_s5, %s375_s5 }
   0x9   :  { %416 = vmatprep.mubr.msk.f32.mxu1 %vm451_vm0, %v450_v2  ;;  %p429_p0 = scmp.ne.s32.totalorder %s375_s5, %s428_s4  ;;  %p434_p2 = scmp.lt.s32.totalorder %s428_s4, %s428_s4 }
   0xb   :  { %p435_p3 = por %p434_p2, %p433_p1 }
   0xd   :  { %p436_p4 = pnand %p435_p3, %p429_p0 }
  0x1e   :  { %42 = vperm.xlu0 %423, %v29_v9  }
  0x91   :  { %v194_v10 = vpop.xlane.xlu0 %193 }
  0x92   :  { %v199_v11 = vmax.f32 %v194_v10, 1.0  ;;  %vm206_vm3 = vcmp.gt.f32.partialorder %v194_v10, 1.0  ;;  %vm211_vm5 = vcmp.gt.f32.partialorder %v194_v10, 0.0 }
  0x94   :  { %424 = vrcp.f32 %v199_v11 }
  0x99   :  { %v43_v26 = vpop.permute.xlu0 %42 }
  0x9a   :  { %vm44_vm4 = vcmp.eq.s32.totalorder %v43_v26, %v40_v25 }
  0x9b   :  { %v384_v31 = vsel %vm44_vm4, 1.0, %v450_v2 }
  0xa1   :  { %v425_v12 = vpop.eup %424 }
  0xc7   :  { %v117_v13 = vpop.f32.mrf.mxu0  ;;  %v188_v14 = vpop.f32.mrf.mxu1 }
  0xc8   :  { %v201_v15 = vmul.f32 %v425_v12, %v117_v13  ;;  %v202_v19 = vmul.f32 %v425_v12, %v188_v14 }
  0xc9   :  { %v403_v16 = vpop.f32.mrf.mxu0  ;;  %v408_v17 = vpop.f32.mrf.mxu1 }
  0xca   :  { %v203_v18 = vmul.f32 %v201_v15, %v201_v15  ;;  %v209_v32 = vsel %vm206_vm3, %v201_v15, %v197_v29 }
  0xcc   :  { %v204_v20 = vsub.f32 %v202_v19, %v203_v18 }
  0xce   :  { %v205_v22 = vmax.f32 %v204_v20, 0.0 }
  0xd0   :  { %v210_v23 = vsel %vm206_vm3, %v205_v22, %v198_v21 }
  0xd1   :  { %v212_v24 = vadd.f32 1e-05, %v210_v23 }
  0xd3   :  { %426 = vrsqrt.f32 %v212_v24 }
  0xe0   :  { %v427_v28 = vpop.eup %426 }
  0xe1   :  { %v214_v30 = vmul.f32 %v427_v28, %v195_v27 }
  0xe3   :  { %v217_v33 = vsel %vm211_vm5, %v214_v30, 0.0  ;;  %410 = vmatpush3.msk.msra.mxu0 %vm211_vm5, %v214_v30 }
  0xe4   :  { %412 = vmatmul.mubr.msk.f32.vlgmr.msra.gmra.mxu0 %vm47_vm1, %v384_v31  ;;  %v218_v35 = vmul.f32 %v217_v33, %v209_v32 }
  0xe6   :  { %v219_v36 = vsub.f32 %v196_v34, %v218_v35 }
  0xe8   :  { %415 = vmatpush3.msk.msra.mxu1 %vm211_vm5, %v219_v36 }
  0xe9   :  { %417 = vmatmul.mubr.msk.f32.vlgmr.msra.gmra.mxu1 %vm47_vm1, %v384_v31 }
 0x1a4   :  { %v290_v37 = vpop.f32.mrf.mxu0 }
 0x1a5   :  { %v364_v38 = vmul.f32 %v290_v37, %v497_v0 }
 0x1a6   :  { %v413_v39 = vpop.f32.mrf.mxu0 }
 0x1a9   :  { %v360_v40 = vpop.f32.mrf.mxu1 }
 0x1aa   :  { %v365_v41 = vadd.f32 %v364_v38, %v360_v40 }
 0x1ab   :  { %v418_v42 = vpop.f32.mrf.mxu1 }
 0x1ac   :  { %367 = vst.msk [vmem:[#allocation2] sm:$0xff] %vm366_vm6, %v365_v41 }
 0x1ad   :  { %439 = shalt.err (!%p436_p4)
}
 0x1ae   :  { %377 = dma.vmem_to_hbm [thread:$0]  %s375_s5, 128, %s540_s7, [#allocation3]  }
 0x1af   :  { %448 = dma.done.wait [#allocation3], 128  }
 0x1b0   :  { %449 = vsyncadd [#allocation3], 4294967168 }
 0x1b1   :  { %381 = vsyncpa [#allocation3], 1 }

</bundles_post_ra>
